<compile_context>
chip_gen: v7x
topology: tpu7x:2x2x1
jax: 0.10.0
libtpu: 0.0.40
codegen_flags: <defaults>
</compile_context>

<pallas_src>
import math

import jax
import jax.numpy as jnp
import numpy as np
from jax import lax
from jax.experimental import pallas as pl
from jax.experimental.pallas import tpu as pltpu


def _round_up(x, m):
    return (x + m - 1) // m * m


_VMEM_LIMIT_CACHE = None


def _vmem_limit_bytes():
    """Per-generation scoped-VMEM request: ~3/4 of physical VMEM, capped at 100 MiB.

    v5e/v6e (128 MiB physical) -> 96 MiB, v7x (64 MiB physical) -> 48 MiB.
    Falls back to 48 MiB if the hardware query is unavailable.
    """
    global _VMEM_LIMIT_CACHE
    if _VMEM_LIMIT_CACHE is None:
        cap = 64 * 1024 * 1024
        try:
            cap = int(getattr(pltpu.get_tpu_info(), "vmem_capacity_bytes", cap))
        except Exception:
            pass
        _VMEM_LIMIT_CACHE = max(32 * 1024 * 1024, min(cap * 3 // 4, 100 * 1024 * 1024))
    return _VMEM_LIMIT_CACHE


# ---------------------------------------------------------------------------
# Tiled linear kernel:  y = x @ W + b   (bf16 MXU, f32 accumulation)
# ---------------------------------------------------------------------------
def _linear_kernel(x_ref, w_ref, b_ref, o_ref, acc_ref):
    @pl.when(pl.program_id(2) == 0)
    def _():
        acc_ref[...] = jnp.zeros_like(acc_ref)

    acc_ref[...] += jnp.dot(x_ref[...].astype(jnp.bfloat16),
                            w_ref[...].astype(jnp.bfloat16),
                            preferred_element_type=jnp.float32)

    @pl.when(pl.program_id(2) == pl.num_programs(2) - 1)
    def _():
        o_ref[...] = (acc_ref[...] + b_ref[...].astype(jnp.float32)
                      ).astype(o_ref.dtype)


def pallas_linear(x2d, w, b, *, tm=512, tn=512, tk=1024):
    M, K = x2d.shape
    N = w.shape[1]

    # Full-dimension blocks for small dims (legal: block dim == array dim) -> no
    # 128 round-up, no zero-pad, no post-slice.  Otherwise large aligned tiles.
    if M <= tm:
        tm, Mp = M, M
    else:
        Mp = _round_up(M, tm)
    if K <= tk:
        tk, Kp = K, K
    else:
        Kp = _round_up(K, tk)
    if N <= tn:
        tn, Np = N, N
    else:
        Np = _round_up(N, tn)

    xp = x2d if (Mp, Kp) == (M, K) else jnp.pad(x2d, ((0, Mp - M), (0, Kp - K)))
    wp = w if (Kp, Np) == (K, N) else jnp.pad(w, ((0, Kp - K), (0, Np - N)))
    bp = (b if Np == N else jnp.pad(b, (0, Np - N))).reshape(1, Np)

    vmem_limit = _vmem_limit_bytes()
    cost = pl.CostEstimate(
        flops=2 * Mp * Np * Kp,
        transcendentals=0,
        bytes_accessed=(Mp * Kp + Kp * Np + Mp * Np) * xp.dtype.itemsize)

    out = pl.pallas_call(
        _linear_kernel,
        out_shape=jax.ShapeDtypeStruct((Mp, Np), x2d.dtype),
        grid=(Mp // tm, Np // tn, Kp // tk),
        in_specs=[
            pl.BlockSpec((tm, tk), lambda i, j, k: (i, k)),
            pl.BlockSpec((tk, tn), lambda i, j, k: (k, j)),
            pl.BlockSpec((1, tn), lambda i, j, k: (0, j)),
        ],
        out_specs=pl.BlockSpec((tm, tn), lambda i, j, k: (i, j)),
        scratch_shapes=[pltpu.VMEM((tm, tn), jnp.float32)],
        compiler_params=pltpu.CompilerParams(
            dimension_semantics=("parallel", "parallel", "arbitrary"),
            vmem_limit_bytes=vmem_limit),
        cost_estimate=cost,
    )(xp, wp, bp)
    return out[:M, :N] if (Mp, Np) != (M, N) else out


# ---------------------------------------------------------------------------
# Attention core.
#   Inputs stay in the projection's natural (S, B, H, Dk) layout (no HBM transpose).
#   Grid = (batch, head-group, query-tile); all axes independent ("parallel").
#   Per head: 2-D QK^T (contract last dims, no k.T), f32 softmax, 2-D PV matmul.
# ---------------------------------------------------------------------------
def _attention_kernel(q_ref, k_ref, v_ref, o_ref, attn_ref):
    hg = q_ref.shape[2]
    for h in range(hg):  # static unroll over the head group; each step is 2-D MXU work
        q = q_ref[:, 0, h, :].astype(jnp.bfloat16)   # (Tq, Dk), pre-scaled by 1/sqrt(Dk)
        k = k_ref[:, 0, h, :].astype(jnp.bfloat16)   # (Sk, Dk)
        v = v_ref[:, 0, h, :].astype(jnp.bfloat16)   # (Sk, Dk)

        # scores[i, j] = sum_d q[i, d] * k[j, d]   (contract last dims; no explicit k.T)
        s = lax.dot_general(q, k, (((1,), (1,)), ((), ())),
                            preferred_element_type=jnp.float32)        # (Tq, Sk) f32

        # softmax over the key axis (== torch softmax(dim=1) on [i, j, b, h]), f32 math,
        # exact division (approx reciprocal removed per review).
        m = jnp.max(s, axis=-1, keepdims=True)
        p = jnp.exp(s - m)
        a = p / jnp.sum(p, axis=-1, keepdims=True)
        attn_ref[0, h] = a.astype(attn_ref.dtype)

        # x[i, d] = sum_j a[i, j] * v[j, d]
        o = jnp.dot(a.astype(jnp.bfloat16), v,
                    preferred_element_type=jnp.float32)                # (Tq, Dk) f32
        o_ref[:, 0, h, :] = o.astype(o_ref.dtype)


def _choose_attn_tiles(H, Sq, Sk, Dk, qkv_bytes, out_bytes, attn_bytes, budget):
    """Pick (head_group Hg, query tile Tq) so the per-step VMEM working set fits."""
    # Hg must divide H and be either the full head count or a multiple of 8
    # (second-to-last block dim tiling rule).
    cands = {H}
    for g in range(8, H, 8):
        if H % g == 0:
            cands.add(g)
    cands = sorted(cands, reverse=True)
    tq_cands = [min(t, _round_up(Sq, 8)) for t in (256, 128, 64, 32, 16, 8)]
    for hg in cands:
        for tq in tq_cands:
            kv = 2 * 2 * hg * Sk * Dk * qkv_bytes            # K,V blocks, double-buffered
            qo = 2 * tq * hg * Dk * (qkv_bytes + out_bytes)  # q + o blocks
            att = 2 * hg * tq * Sk * attn_bytes              # attn output block
            tmp = 4 * tq * Sk * 4                            # f32 score/softmax temps
            if kv + qo + att + tmp <= budget:
                return hg, tq
    return cands[-1], tq_cands[-1]   # best effort (toy / extreme shapes)


def pallas_attention(q, k, v, *, attn_dtype=jnp.bfloat16):
    # q: (Sq, B, H, Dk), already pre-scaled by 1/sqrt(Dk); k/v: (Sk, B, H, Dk)
    Sq, B, H, Dk = q.shape
    Sk = k.shape[0]

    vmem_limit = _vmem_limit_bytes()
    hg, tq = _choose_attn_tiles(
        H, Sq, Sk, Dk,
        qkv_bytes=q.dtype.itemsize, out_bytes=q.dtype.itemsize,
        attn_bytes=jnp.dtype(attn_dtype).itemsize,
        budget=int(0.7 * vmem_limit))

    Sqp = _round_up(Sq, tq)
    if Sqp != Sq:
        q = jnp.pad(q, ((0, Sqp - Sq), (0, 0), (0, 0), (0, 0)))

    itemsize = q.dtype.itemsize
    cost = pl.CostEstimate(
        flops=4 * B * H * Sqp * Sk * Dk,
        transcendentals=B * H * Sqp * Sk,
        bytes_accessed=(q.size + k.size + v.size + B * H * Sqp * Dk) * itemsize
                       + B * H * Sqp * Sk * jnp.dtype(attn_dtype).itemsize)

    out, attn = pl.pallas_call(
        _attention_kernel,
        out_shape=(
            jax.ShapeDtypeStruct((Sqp, B, H, Dk), q.dtype),
            jax.ShapeDtypeStruct((B, H, Sqp, Sk), attn_dtype),
        ),
        grid=(B, H // hg, Sqp // tq),
        in_specs=[
            pl.BlockSpec((tq, 1, hg, Dk), lambda b, h, i: (i, b, h, 0)),
            pl.BlockSpec((Sk, 1, hg, Dk), lambda b, h, i: (0, b, h, 0)),
            pl.BlockSpec((Sk, 1, hg, Dk), lambda b, h, i: (0, b, h, 0)),
        ],
        out_specs=(
            pl.BlockSpec((tq, 1, hg, Dk), lambda b, h, i: (i, b, h, 0)),
            pl.BlockSpec((1, hg, tq, Sk), lambda b, h, i: (b, h, i, 0)),
        ),
        compiler_params=pltpu.CompilerParams(
            dimension_semantics=("parallel", "parallel", "parallel"),
            vmem_limit_bytes=vmem_limit),
        cost_estimate=cost,
    )(q, k, v)

    if Sqp != Sq:
        out = out[:Sq]
        attn = attn[:, :, :Sq]
    return out, attn


# ---------------------------------------------------------------------------
# Parameter init (deterministic, mirrors nn.Linear shapes: W stored as (in, out))
# ---------------------------------------------------------------------------
def init_mha_params(key, heads, d_model, dtype=jnp.float32):
    d_k = d_model // heads
    ks = jax.random.split(key, 8)

    def linear(kw, kb, fan_in, fan_out):
        bound = 1.0 / math.sqrt(fan_in)
        w = jax.random.uniform(kw, (fan_in, fan_out), dtype, -bound, bound)
        b = jax.random.uniform(kb, (fan_out,), dtype, -bound, bound)
        return w, b

    wq, bq = linear(ks[0], ks[1], d_model, heads * d_k)
    wk, bk = linear(ks[2], ks[3], d_model, heads * d_k)
    wv, bv = linear(ks[4], ks[5], d_model, heads * d_k)
    wo, bo = linear(ks[6], ks[7], d_model, d_model)
    return dict(wq=wq, bq=bq, wk=wk, bk=bk, wv=wv, bv=bv, wo=wo, bo=bo)


# ---------------------------------------------------------------------------
# Forward pass (Pallas) and pure-JAX reference
# ---------------------------------------------------------------------------
def multi_head_attention(params, query, key, value, heads):
    # query/key/value: (seq, batch, d_model)
    Sq, B, D = query.shape
    Sk = key.shape[0]
    d_k = D // heads
    scale = 1.0 / math.sqrt(d_k)

    # Fold the 1/sqrt(d_k) score scale into the query projection weights.
    wq = params["wq"] * scale
    bq = params["bq"] * scale

    def project(x, w, b, S):
        y = pallas_linear(x.reshape(S * B, D), w, b)   # (S*B, heads*d_k)
        return y.reshape(S, B, heads, d_k)             # free reshape; no HBM transpose

    q = project(query, wq, bq, Sq)
    k = project(key, params["wk"], params["bk"], Sk)
    v = project(value, params["wv"], params["bv"], Sk)

    # o: (Sq, B, H, d_k) in-place layout, attn: (B, H, Sq, Sk) in bf16.
    o, attn = pallas_attention(q, k, v)

    # Output projection straight off the (Sq, B, H, d_k) layout -> no transposes.
    out2d = pallas_linear(o.reshape(Sq * B, D), params["wo"], params["bo"])
    out = out2d.reshape(Sq, B, D)

    # NOTE: torch's self.attn layout is jnp.transpose(attn, (2, 3, 0, 1)); the permute
    # is deferred to callers that actually need it (it is a full O(S^2) HBM pass).
    return out, attn


def mha_reference(params, query, key, value, heads):
    Sq, B, D = query.shape
    Sk = key.shape[0]
    d_k = D // heads
    q = (query @ params["wq"] + params["bq"]).reshape(Sq, B, heads, d_k)
    k = (key @ params["wk"] + params["bk"]).reshape(Sk, B, heads, d_k)
    v = (value @ params["wv"] + params["bv"]).reshape(Sk, B, heads, d_k)
    scores = jnp.einsum("ibhd,jbhd->bhij", q, k) * (1.0 / math.sqrt(d_k))
    attn = jax.nn.softmax(scores, axis=-1)                       # (B, H, Sq, Sk)
    x = jnp.einsum("bhij,jbhd->ibhd", attn, v).reshape(Sq, B, D)
    return x @ params["wo"] + params["bo"], attn


# ---------------------------------------------------------------------------
if __name__ == "__main__":
    heads = 4
    d_model = 32
    seq = 8
    batch = 2

    root = jax.random.PRNGKey(0)
    kp, kq, kk, kv = jax.random.split(root, 4)

    params = init_mha_params(kp, heads, d_model)
    query = jax.random.normal(kq, (seq, batch, d_model), jnp.float32)
    key = jax.random.normal(kk, (seq, batch, d_model), jnp.float32)
    value = jax.random.normal(kv, (seq, batch, d_model), jnp.float32)

    out, attn = multi_head_attention(params, query, key, value, heads)
    out = jax.block_until_ready(out)
    attn = jax.block_until_ready(attn)

    ref_out, ref_attn = mha_reference(params, query, key, value, heads)

    assert out.shape == (seq, batch, d_model)
    assert attn.shape == (batch, heads, seq, seq)
    # Tolerances account for the deliberate bf16 MXU inputs (q/k/v/p and both
    # projections) and the bf16 attn materialization; math/accumulation is f32.
    np.testing.assert_allclose(np.asarray(out), np.asarray(ref_out),
                               rtol=5e-2, atol=5e-2)
    np.testing.assert_allclose(np.asarray(attn.astype(jnp.float32)),
                               np.asarray(ref_attn), rtol=3e-2, atol=3e-2)

    print("KERNEL_OK")
</pallas_src>

<mosaic_0001>
module attributes {stable_mosaic.version = 11 : i64} {
  func.func @_linear_kernel(%arg0: i32, %arg1: i32, %arg2: i32, %arg3: memref<16x32xf32, #tpu.memory_space<vmem>>, %arg4: memref<32x32xf32, #tpu.memory_space<vmem>>, %arg5: memref<1x32xf32, #tpu.memory_space<vmem>>, %arg6: memref<16x32xf32, #tpu.memory_space<vmem>>, %arg7: memref<16x32xf32, #tpu.memory_space<vmem>>) attributes {dimension_semantics = [#tpu.dimension_semantics<parallel>, #tpu.dimension_semantics<parallel>, #tpu.dimension_semantics<arbitrary>], iteration_bounds = array<i64: 1, 1, 1>, scalar_prefetch = 0 : i64, scratch_operands = 1 : i64, tpu.core_type = #tpu.core_type<tc>, window_params = [{transform_indices = @transform_0, window_bounds = array<i64: 16, 32>}, {transform_indices = @transform_1, window_bounds = array<i64: 32, 32>}, {transform_indices = @transform_2, window_bounds = array<i64: 1, 32>}, {transform_indices = @transform_3, window_bounds = array<i64: 16, 32>}]} {
    %c0_i32 = arith.constant 0 : i32
    %0 = arith.cmpi eq, %arg2, %c0_i32 : i32
    %1 = arith.extui %0 : i1 to i32
    %c0_i32_0 = arith.constant 0 : i32
    %2 = arith.cmpi ne, %1, %c0_i32_0 : i32
    scf.if %2 {
      %cst_10 = arith.constant 0.000000e+00 : f32
      %14 = vector.broadcast %cst_10 : f32 to vector<16x32xf32>
      %c0_11 = arith.constant 0 : index
      %c0_12 = arith.constant 0 : index
      %15 = vector.load %arg7[%c0_11, %c0_12] : memref<16x32xf32, #tpu.memory_space<vmem>>, vector<16x32xf32>
      tpu.vector_store %arg7[%c0_11, %c0_12], %14 {strides = array<i32>} : memref<16x32xf32, #tpu.memory_space<vmem>>, vector<16x32xf32>,
    } else {
    }
    %c0 = arith.constant 0 : index
    %c0_1 = arith.constant 0 : index
    %3 = vector.load %arg7[%c0, %c0_1] : memref<16x32xf32, #tpu.memory_space<vmem>>, vector<16x32xf32>
    %c0_2 = arith.constant 0 : index
    %c0_3 = arith.constant 0 : index
    %4 = vector.load %arg3[%c0_2, %c0_3] : memref<16x32xf32, #tpu.memory_space<vmem>>, vector<16x32xf32>
    %5 = arith.truncf %4 : vector<16x32xf32> to vector<16x32xbf16>
    %c0_4 = arith.constant 0 : index
    %c0_5 = arith.constant 0 : index
    %6 = vector.load %arg4[%c0_4, %c0_5] : memref<32x32xf32, #tpu.memory_space<vmem>>, vector<32x32xf32>
    %7 = arith.truncf %6 : vector<32x32xf32> to vector<32x32xbf16>
    %cst = arith.constant dense<0.000000e+00> : vector<16x32xf32>
    %8 = tpu.matmul %5, %7, %cst {dimension_numbers = #tpu.dot_dimension_numbers<[1], [0], [0], [1], [0, 0, 1, 1], [], []>} : vector<16x32xbf16>, vector<32x32xbf16>, vector<16x32xf32> -> vector<16x32xf32>
    %9 = arith.addf %3, %8 : vector<16x32xf32>
    %c0_6 = arith.constant 0 : index
    %c0_7 = arith.constant 0 : index
    %10 = vector.load %arg7[%c0_6, %c0_7] : memref<16x32xf32, #tpu.memory_space<vmem>>, vector<16x32xf32>
    tpu.vector_store %arg7[%c0_6, %c0_7], %9 {strides = array<i32>} : memref<16x32xf32, #tpu.memory_space<vmem>>, vector<16x32xf32>,
    %c0_i32_8 = arith.constant 0 : i32
    %11 = arith.cmpi eq, %arg2, %c0_i32_8 : i32
    %12 = arith.extui %11 : i1 to i32
    %c0_i32_9 = arith.constant 0 : i32
    %13 = arith.cmpi ne, %12, %c0_i32_9 : i32
    scf.if %13 {
      %c0_10 = arith.constant 0 : index
      %c0_11 = arith.constant 0 : index
      %14 = vector.load %arg7[%c0_10, %c0_11] : memref<16x32xf32, #tpu.memory_space<vmem>>, vector<16x32xf32>
      %c0_12 = arith.constant 0 : index
      %c0_13 = arith.constant 0 : index
      %15 = vector.load %arg5[%c0_12, %c0_13] : memref<1x32xf32, #tpu.memory_space<vmem>>, vector<1x32xf32>
      %16 = vector.broadcast %15 : vector<1x32xf32> to vector<16x32xf32>
      %17 = arith.addf %14, %16 : vector<16x32xf32>
      %c0_14 = arith.constant 0 : index
      %c0_15 = arith.constant 0 : index
      %18 = vector.load %arg6[%c0_14, %c0_15] : memref<16x32xf32, #tpu.memory_space<vmem>>, vector<16x32xf32>
      tpu.vector_store %arg6[%c0_14, %c0_15], %17 {strides = array<i32>} : memref<16x32xf32, #tpu.memory_space<vmem>>, vector<16x32xf32>,
    } else {
    }
    return
  }
  func.func @transform_0(%arg0: i32, %arg1: i32, %arg2: i32) -> (i32, i32) {
    %c0_i32 = arith.constant 0 : i32
    return %arg0, %arg2 : i32, i32
  }
  func.func @transform_1(%arg0: i32, %arg1: i32, %arg2: i32) -> (i32, i32) {
    %c0_i32 = arith.constant 0 : i32
    return %arg2, %arg1 : i32, i32
  }
  func.func @transform_2(%arg0: i32, %arg1: i32, %arg2: i32) -> (i32, i32) {
    %c0_i32 = arith.constant 0 : i32
    %c0_i32_0 = arith.constant 0 : i32
    return %c0_i32, %arg1 : i32, i32
  }
  func.func @transform_3(%arg0: i32, %arg1: i32, %arg2: i32) -> (i32, i32) {
    %c0_i32 = arith.constant 0 : i32
    return %arg0, %arg1 : i32, i32
  }
}

</mosaic_0001>

<bundles_post_ra>
// kernel: tpu_custom_call.1
= control target key start
LH: loop header
LB: loop body
LE: loop exit
PB: predicated region body
PF: predicated region fallthrough
CT: control target
= control target key end

     0   :  { %8 = vsyncpa [#allocation4], 0  ;;  %s319_s0 = inlined_call_operand.hbm [shape: f32[16,32], index: 0, kind: input, shape index: {}]   ;;  %s320_s1 = inlined_call_operand.hbm [shape: f32[32,32], index: 1, kind: input, shape index: {}]   ;;  %s321_s2 = inlined_call_operand.vmem [shape: f32[1,32], index: 2, kind: input, shape index: {}]   ;;  %s322_s3 = inlined_call_operand.hbm [shape: f32[16,32], index: 3, kind: output, shape index: {}]  }
   0x1   :  { %9 = vsyncpa [#allocation7], 0 }
   0x2   :  { %10 = vsyncpa [#allocation5], 0  ;;  %s237_s12 = smov [#allocation3]   ;;  %s165_s16 = scalar_lea.hbm %s319_s0, 256 }
   0x3   :  { %s16_s13 = sshll.u32 %s237_s12, 4  ;;  %p166_p0 = scmp.ne.s32.totalorder %s319_s0, %s165_s16  ;;  %s17_s13 = int_to_ptr.vmem [resolvable:$true] %s16_s13 }
   0x4   :  { %p169_p1 = scmp.lt.u32.totalorder %s165_s16, %s319_s0 }
   0x6   :  { %p171_p2 = pnand %p169_p1, %p166_p0 }
   0x8   :  { %174 = shalt.err (!%p171_p2)
}
   0x9   :  { %s175_s21 = scalar_lea.vmem %s17_s13, 256  ;;  %p180_p4 = scmp.lt.s32.totalorder %s17_s13, %s17_s13 }
   0xa   :  { %p176_p3 = scmp.ne.s32.totalorder %s17_s13, %s175_s21  ;;  %p181_p5 = scmp.lt.s32.totalorder %s175_s21, %s175_s21 }
   0xc   :  { %p182_p6 = por %p181_p5, %p180_p4 }
   0xe   :  { %p183_p7 = pnand %p182_p6, %p176_p3 }
  0x10   :  { %186 = shalt.err (!%p183_p7)
}
  0x11   :  { %s238_s22 = smov 128   ;;  %s239_s23 = smov 8  }
  0x12   :  { %22 = dma.hbm_to_vmem [thread:$0]  %s319_s0, 256, %s17_s13, [#allocation4], %s238_s22, %s238_s22, %s239_s23  }
  0x13   :  { %s240_s26 = smov [#allocation6]   ;;  %s187_s30 = scalar_lea.hbm %s320_s1, 512 }
  0x14   :  { %s28_s27 = sshll.u32 %s240_s26, 4  ;;  %p188_p8 = scmp.ne.s32.totalorder %s320_s1, %s187_s30  ;;  %s29_s27 = int_to_ptr.vmem [resolvable:$true] %s28_s27 }
  0x15   :  { %p191_p9 = scmp.lt.u32.totalorder %s187_s30, %s320_s1 }
  0x17   :  { %p193_p10 = pnand %p191_p9, %p188_p8 }
  0x19   :  { %196 = shalt.err (!%p193_p10)
}
  0x1a   :  { %s197_s8 = scalar_lea.vmem %s29_s27, 512  ;;  %p202_p12 = scmp.lt.s32.totalorder %s29_s27, %s29_s27 }
  0x1b   :  { %p198_p11 = scmp.ne.s32.totalorder %s29_s27, %s197_s8  ;;  %p203_p13 = scmp.lt.s32.totalorder %s197_s8, %s197_s8 }
  0x1d   :  { %p204_p0 = por %p203_p13, %p202_p12 }
  0x1f   :  { %p205_p1 = pnand %p204_p0, %p198_p11 }
  0x21   :  { %208 = shalt.err (!%p205_p1)
}
  0x22   :  { %34 = dma.hbm_to_vmem [thread:$0]  %s320_s1, 512, %s29_s27, [#allocation7], %s238_s22, %s238_s22, %s239_s23  }
  0x23   :  { %231 = dma.done.wait [#allocation4], 256  }
  0x24   :  { %232 = vsyncadd [#allocation4], 4294967040 }
  0x25   :  { %233 = dma.done.wait [#allocation7], 512  }
  0x26   :  { %234 = vsyncadd [#allocation7], 4294966784  ;;  %vm48_vm0 = vcmask 261120   ;;  %v241_v0 = vmov 0.0   ;;  %vm242_vm1 = vmmov 0   ;;  %v56_v1 = vld [vmem:[#allocation6] sm:$0xff] }
  0x27   :  { %150 = vmatprep.subr.bf16.mxu0 %v241_v0  ;;  %154 = vmatprep.mubr.msk.bf16.mxu0 %vm242_vm1, %v241_v0  ;;  %49 = vst.msk [vmem:[#allocation2] sm:$0xff] %vm48_vm0, %v241_v0  ;;  %50 = vst.msk [vmem:[#allocation2 + $0x8] sm:$0xff] %vm48_vm0, %v241_v0  ;;  %v57_v2 = vld [vmem:[#allocation6 + $0x8] sm:$0xff]  ;;  %v58_v3 = vld [vmem:[#allocation6 + $0x10] sm:$0xff]  ;;  %s243_s11 = smov [#allocation8]  }
  0x28   :  { %v60_v4 = vpack.c.bf16 %v57_v2, %v56_v1  ;;  %v59_v5 = vld [vmem:[#allocation6 + $0x18] sm:$0xff]  ;;  %v53_v7 = vld [vmem:[#allocation3] sm:$0xff]  ;;  %v146_v18 = vld [vmem:[%s321_s2] ss:$0 sm:$0xff]  ;;  %s132_s12 = sshll.u32 %s243_s11, 4  ;;  %s133_s12 = int_to_ptr.vmem [resolvable:$true] %s132_s12 }
  0x29   :  { %v61_v6 = vpack.c.bf16 %v59_v5, %v58_v3  ;;  %v54_v8 = vld [vmem:[#allocation3 + $0x8] sm:$0xff]  ;;  %s209_s13 = scalar_lea.vmem %s133_s12, 256  ;;  %p214_p3 = scmp.lt.s32.totalorder %s133_s12, %s133_s12 }
  0x2a   :  { %151 = vmatpush3.bf16.msra.mxu0 %v60_v4  ;;  %v55_v9 = vpack.c.bf16 %v54_v8, %v53_v7  ;;  %p210_p2 = scmp.ne.s32.totalorder %s133_s12, %s209_s13  ;;  %p215_p4 = scmp.lt.s32.totalorder %s209_s13, %s209_s13 }
  0x2b   :  { %152 = vmatprep.subr.bf16.mxu0 %v241_v0 }
  0x2c   :  { %p216_p5 = por %p215_p4, %p214_p3 }
  0x2e   :  { %153 = vmatpush3.bf16.msra.mxu0 %v61_v6  ;;  %v51_v10 = vld [vmem:[#allocation2] sm:$0xff]  ;;  %v52_v12 = vld [vmem:[#allocation2 + $0x8] sm:$0xff]  ;;  %p217_p6 = pnand %p216_p5, %p210_p2 }
  0x31   :  { %155 = vmatmul.mubr.msk.bf16.vlgmr.msra.gmra.mrb[0].mxu0 %vm48_vm0, %v55_v9 }
 0x104   :  { %v100_v11 = vpop.f32.mrb[0].mxu0 }
 0x105   :  { %v107_v13 = vadd.f32 %v100_v11, %v51_v10  ;;  %v156_v14 = vpop.f32.mrb[1].mxu0 }
 0x106   :  { %v103_v15 = vpop.f32.mrb[2].mxu0 }
 0x107   :  { %109 = vst.msk [vmem:[#allocation2] sm:$0xff] %vm48_vm0, %v107_v13  ;;  %v108_v16 = vadd.f32 %v103_v15, %v52_v12  ;;  %v157_v17 = vpop.f32.mrb[3].mxu0 }
 0x109   :  { %110 = vst.msk [vmem:[#allocation2 + $0x8] sm:$0xff] %vm48_vm0, %v108_v16 }
 0x10e   :  { %v114_v19 = vld [vmem:[#allocation2] sm:$0xff] }
 0x10f   :  { %v123_v20 = vadd.f32 %v146_v18, %v114_v19 }
 0x110   :  { %v115_v21 = vld [vmem:[#allocation2 + $0x8] sm:$0xff] }
 0x111   :  { %v124_v22 = vadd.f32 %v146_v18, %v115_v21  ;;  %125 = vst.msk [vmem:[#allocation8] sm:$0xff] %vm48_vm0, %v123_v20 }
 0x113   :  { %126 = vst.msk [vmem:[#allocation8 + $0x8] sm:$0xff] %vm48_vm0, %v124_v22 }
 0x114   :  { %220 = shalt.err (!%p217_p6)
}
 0x115   :  { %s221_s15 = scalar_lea.hbm %s322_s3, 256 }
 0x116   :  { %p222_p7 = scmp.ne.s32.totalorder %s322_s3, %s221_s15  ;;  %p225_p8 = scmp.lt.u32.totalorder %s221_s15, %s322_s3 }
 0x118   :  { %p227_p9 = pnand %p225_p8, %p222_p7 }
 0x11a   :  { %230 = shalt.err (!%p227_p9)
}
 0x11b   :  { %138 = dma.vmem_to_hbm [thread:$0]  %s133_s12, 256, %s322_s3, [#allocation5], %s238_s22, %s238_s22, %s239_s23  }
 0x11c   :  { %235 = dma.done.wait [#allocation5], 256  }
 0x11d   :  { %236 = vsyncadd [#allocation5], 4294967040 }
 0x11e   :  { %142 = vsyncpa [#allocation4], 1 }
 0x11f   :  { %143 = vsyncpa [#allocation7], 1 }
 0x120   :  { %144 = vsyncpa [#allocation5], 1 }

</bundles_post_ra>
